<compile_context>
chip_gen: v7x
topology: tpu7x:2x2x1
jax: 0.10.0
libtpu: 0.0.40
codegen_flags: <defaults>
</compile_context>

<pallas_src>
import functools

import jax
import jax.numpy as jnp
from jax.experimental import pallas as pl
from jax.experimental.pallas import tpu as pltpu


LANE = 128
SUBLANE = 8
MAX_TILE_B = 1024            # upper bound on rows per grid step
MEGACORE_SPLIT_B = 512       # batches >= this get >= 2 grid steps (v7x: 2 TCs)
SINGLE_BUFFER_W_BYTES = 2 << 20   # Buffered(1) for weights above this size


def _round_up(x, m):
    return -(-x // m) * m


def _cdiv(a, b):
    return -(-a // b)


def actor_forward_kernel(state_ref, w1_ref, w23_ref, b_ref, out_ref, xpad_ref):
    """Fused 3-layer MLP: relu(x@W1+b1) -> relu(.@W2+b2) -> tanh(.@W3+b3).

    state_ref: (tile_b, in_dim)              f32   unpadded feature dim
    w1_ref:    (in_pad, hid_pad)             bf16  fc1 weight (zero padded)
    w23_ref:   (hid_pad, hid_pad + out_pad)  bf16  [W2 | W3] packed along lanes
    b_ref:     (1, 2*hid_pad + out_pad)      f32   [b1 | b2 | b3]
    out_ref:   (tile_b, out_pad)             f32   lane-dense output
    xpad_ref:  (tile_b, in_pad)              f32   scratch: K-zero-extended state
    """
    in_dim = state_ref.shape[1]
    hid_pad = w1_ref.shape[1]
    out_pad = out_ref.shape[1]

    # Zero-extend the state's feature (K) dim inside the kernel — avoids the
    # wrapper-side padded-slab HBM pass. Full zero write + masked overwrite
    # keeps the padding lanes exactly 0 regardless of how the "parallel" grid
    # steps are sharded across TensorCores.
    xpad_ref[...] = jnp.zeros_like(xpad_ref)
    xpad_ref[:, 0:in_dim] = state_ref[...]
    x = xpad_ref[...].astype(jnp.bfloat16)             # bf16 MXU operand

    # fc1 + relu.  MXU runs bf16, accumulate + elementwise stay f32.
    h1 = jnp.dot(x, w1_ref[...], preferred_element_type=jnp.float32)
    h1 = jnp.maximum(h1 + b_ref[:, 0:hid_pad], 0.0)

    # fc2 + relu (128-aligned lane slices of the packed weight are free views).
    h2 = jnp.dot(h1.astype(jnp.bfloat16), w23_ref[:, 0:hid_pad],
                 preferred_element_type=jnp.float32)
    h2 = jnp.maximum(h2 + b_ref[:, hid_pad:2 * hid_pad], 0.0)

    # fc3 + tanh (padded output lanes are tanh(0) = 0; sliced off in wrapper).
    h3 = jnp.dot(h2.astype(jnp.bfloat16), w23_ref[:, hid_pad:hid_pad + out_pad],
                 preferred_element_type=jnp.float32)
    out_ref[...] = jnp.tanh(h3 + b_ref[:, 2 * hid_pad:2 * hid_pad + out_pad])


def pack_actor_params(w1, b1, w2, b2, w3, b3):
    """Pad to vreg geometry (decoupled per-dim pads) and pack for the kernel.

    Returns:
      w1_packed  bf16 (in_pad, hid_pad)
      w23_packed bf16 (hid_pad, hid_pad + out_pad)   -> [W2 | W3]
      b_packed   f32  (1, 2*hid_pad + out_pad)       -> [b1 | b2 | b3]
    """
    in_dim, hidden = w1.shape
    out_dim = w3.shape[1]
    in_pad = _round_up(in_dim, LANE)
    hid_pad = _round_up(hidden, LANE)
    out_pad = _round_up(out_dim, LANE)

    w1p = jnp.zeros((in_pad, hid_pad), jnp.float32).at[:in_dim, :hidden].set(w1)
    w1p = w1p.astype(jnp.bfloat16)

    w23 = jnp.zeros((hid_pad, hid_pad + out_pad), jnp.float32)
    w23 = w23.at[:hidden, :hidden].set(w2)
    w23 = w23.at[:hidden, hid_pad:hid_pad + out_dim].set(w3)
    w23 = w23.astype(jnp.bfloat16)

    bp = jnp.zeros((1, 2 * hid_pad + out_pad), jnp.float32)
    bp = bp.at[0, :hidden].set(b1)
    bp = bp.at[0, hid_pad:hid_pad + hidden].set(b2)
    bp = bp.at[0, 2 * hid_pad:2 * hid_pad + out_dim].set(b3)
    return w1p, w23, bp


@functools.partial(jax.jit, static_argnames=("out_dim",))
def actor_forward(state, w1_packed, w23_packed, b_packed, *, out_dim):
    batch, in_dim = state.shape
    in_pad, hid_pad = w1_packed.shape
    out_pad = w23_packed.shape[1] - hid_pad
    assert in_dim <= in_pad and out_dim <= out_pad

    # ---- batch tiling -------------------------------------------------------
    # Few, big grid steps (amortize ~0.35us/step); >= 2 steps once the batch is
    # large enough so both v7x TensorCores get work (costs only one extra cheap
    # step on single-TC v5e/v6e); tile derived from cdiv(batch, num_tiles) so
    # last-tile waste stays below one sublane-rounded remainder.
    num_tiles = max(_cdiv(batch, MAX_TILE_B),
                    2 if batch >= MEGACORE_SPLIT_B else 1)
    tile_b = _round_up(_cdiv(batch, num_tiles), SUBLANE)
    grid_b = _cdiv(batch, tile_b)
    b_pad = grid_b * tile_b

    # Row-only padding (feature dim stays at in_dim): tiny vs. the old
    # (b_pad, 128) zero slab; padded rows are dropped by the final slice.
    if b_pad != batch:
        state = jnp.pad(state, ((0, b_pad - batch), (0, 0)))

    # ---- honest VMEM budget -------------------------------------------------
    w_bytes = (w1_packed.size * w1_packed.dtype.itemsize
               + w23_packed.size * w23_packed.dtype.itemsize
               + b_packed.size * b_packed.dtype.itemsize)
    single_buffer_weights = w_bytes > SINGLE_BUFFER_W_BYTES
    w_bufs = 1 if single_buffer_weights else 2
    vmem_bytes = (
        2 * tile_b * in_dim * 4            # state tiles (double-buffered)
        + 2 * tile_b * out_pad * 4         # output tiles (double-buffered)
        + w_bufs * w_bytes                 # resident packed weights/biases
        + tile_b * in_pad * 4              # xpad scratch
        + 2 * tile_b * hid_pad * 4         # h1 / h2 intermediates
        + (1 << 20))                       # MXU staging / compiler slack
    vmem_limit = int(min(32 << 20, max(vmem_bytes, 4 << 20)))

    # Constant-index (revisited) operands: single-buffer them once they are
    # big enough for the duplicate pipeline buffer to matter; keep the default
    # pipelining for small weights.
    w_mode = pl.Buffered(1) if single_buffer_weights else None

    out = pl.pallas_call(
        actor_forward_kernel,
        out_shape=jax.ShapeDtypeStruct((b_pad, out_pad), jnp.float32),
        grid=(grid_b,),
        in_specs=[
            pl.BlockSpec((tile_b, in_dim), lambda i: (i, 0)),          # state
            pl.BlockSpec((in_pad, hid_pad), lambda i: (0, 0),          # W1
                         pipeline_mode=w_mode),
            pl.BlockSpec((hid_pad, hid_pad + out_pad), lambda i: (0, 0),  # W2|W3
                         pipeline_mode=w_mode),
            pl.BlockSpec((1, 2 * hid_pad + out_pad), lambda i: (0, 0),  # biases
                         pipeline_mode=w_mode),
        ],
        out_specs=pl.BlockSpec((tile_b, out_pad), lambda i: (i, 0)),
        scratch_shapes=[pltpu.VMEM((tile_b, in_pad), jnp.float32)],
        compiler_params=pltpu.CompilerParams(
            dimension_semantics=("parallel",),
            vmem_limit_bytes=vmem_limit,
        ),
    )(state, w1_packed, w23_packed, b_packed)

    return out[:batch, :out_dim]


def xavier_uniform(key, fan_in, fan_out, dtype=jnp.float32):
    # matches torch.nn.init.xavier_uniform_ (gain=1.0)
    limit = jnp.sqrt(6.0 / (fan_in + fan_out))
    return jax.random.uniform(key, (fan_in, fan_out), dtype=dtype,
                              minval=-limit, maxval=limit)


def init_actor_params(key, input_dim, hidden_dim, output_dim):
    k1, k2, k3 = jax.random.split(key, 3)
    w1 = xavier_uniform(k1, input_dim, hidden_dim)
    b1 = jnp.zeros((hidden_dim,), jnp.float32)
    w2 = xavier_uniform(k2, hidden_dim, hidden_dim)
    b2 = jnp.zeros((hidden_dim,), jnp.float32)
    w3 = xavier_uniform(k3, hidden_dim, output_dim)
    b3 = jnp.zeros((output_dim,), jnp.float32)
    return w1, b1, w2, b2, w3, b3


def actor_forward_ref(state, w1, b1, w2, b2, w3, b3):
    # plain-JAX f32 reference (mirrors the PyTorch forward)
    x = jnp.maximum(state @ w1 + b1, 0.0)
    x = jnp.maximum(x @ w2 + b2, 0.0)
    return jnp.tanh(x @ w3 + b3)


if __name__ == "__main__":
    # CartPole-like shapes: state dim 4, hidden 32, action dim 1, batch 2.
    batch, input_dim, hidden_dim, output_dim = 2, 4, 32, 1

    key = jax.random.PRNGKey(0)
    key_params, key_state = jax.random.split(key)

    params = init_actor_params(key_params, input_dim, hidden_dim, output_dim)
    state = jax.random.normal(key_state, (batch, input_dim), jnp.float32)

    w1_packed, w23_packed, b_packed = pack_actor_params(*params)

    out = jax.block_until_ready(
        actor_forward(state, w1_packed, w23_packed, b_packed,
                      out_dim=output_dim))
    ref = actor_forward_ref(state, *params)
    assert out.shape == (batch, output_dim), out.shape
    # bf16 MXU operands -> relaxed tolerance vs. the f32 reference.
    assert jnp.allclose(out, ref, atol=3e-2, rtol=3e-2), (out, ref)

    # Multi-tile / megacore path: non-multiple batch exercises the row-only
    # padding and a 2-step "parallel" grid (both v7x TensorCores get work).
    big_batch = 1000
    big_state = jax.random.normal(jax.random.PRNGKey(1),
                                  (big_batch, input_dim), jnp.float32)
    big_out = jax.block_until_ready(
        actor_forward(big_state, w1_packed, w23_packed, b_packed,
                      out_dim=output_dim))
    big_ref = actor_forward_ref(big_state, *params)
    assert big_out.shape == (big_batch, output_dim)
    assert jnp.allclose(big_out, big_ref, atol=3e-2, rtol=3e-2)

    print("KERNEL_OK")
</pallas_src>

<mosaic_0001>
module attributes {stable_mosaic.version = 11 : i64} {
  func.func @actor_forward_kernel(%arg0: i32, %arg1: memref<8x4xf32, #tpu.memory_space<vmem>>, %arg2: memref<128x128xbf16, #tpu.memory_space<vmem>>, %arg3: memref<128x256xbf16, #tpu.memory_space<vmem>>, %arg4: memref<1x384xf32, #tpu.memory_space<vmem>>, %arg5: memref<8x128xf32, #tpu.memory_space<vmem>>, %arg6: memref<8x128xf32, #tpu.memory_space<vmem>>) attributes {dimension_semantics = [#tpu.dimension_semantics<parallel>], iteration_bounds = array<i64: 1>, scalar_prefetch = 0 : i64, scratch_operands = 1 : i64, tpu.core_type = #tpu.core_type<tc>, window_params = [{transform_indices = @transform_0, window_bounds = array<i64: 8, 4>}, {pipeline_mode = #tpu.pipeline_mode<synchronous>, transform_indices = @transform_1, window_bounds = array<i64: 128, 128>}, {pipeline_mode = #tpu.pipeline_mode<synchronous>, transform_indices = @transform_2, window_bounds = array<i64: 128, 256>}, {pipeline_mode = #tpu.pipeline_mode<synchronous>, transform_indices = @transform_3, window_bounds = array<i64: 1, 384>}, {transform_indices = @transform_4, window_bounds = array<i64: 8, 128>}]} {
    %cst = arith.constant 0.000000e+00 : f32
    %0 = vector.broadcast %cst : f32 to vector<8x128xf32>
    %c0 = arith.constant 0 : index
    %c0_0 = arith.constant 0 : index
    %1 = vector.load %arg6[%c0, %c0_0] : memref<8x128xf32, #tpu.memory_space<vmem>>, vector<8x128xf32>
    tpu.vector_store %arg6[%c0, %c0_0], %0 {strides = array<i32>} : memref<8x128xf32, #tpu.memory_space<vmem>>, vector<8x128xf32>,
    %c0_1 = arith.constant 0 : index
    %c0_2 = arith.constant 0 : index
    %2 = vector.load %arg1[%c0_1, %c0_2] : memref<8x4xf32, #tpu.memory_space<vmem>>, vector<8x4xf32>
    %c0_3 = arith.constant 0 : index
    %c0_4 = arith.constant 0 : index
    %3 = vector.load %arg6[%c0_3, %c0_4] : memref<8x128xf32, #tpu.memory_space<vmem>>, vector<8x4xf32>
    tpu.vector_store %arg6[%c0_3, %c0_4], %2 {strides = array<i32>} : memref<8x128xf32, #tpu.memory_space<vmem>>, vector<8x4xf32>,
    %c0_5 = arith.constant 0 : index
    %c0_6 = arith.constant 0 : index
    %4 = vector.load %arg6[%c0_5, %c0_6] : memref<8x128xf32, #tpu.memory_space<vmem>>, vector<8x128xf32>
    %5 = arith.truncf %4 : vector<8x128xf32> to vector<8x128xbf16>
    %c0_7 = arith.constant 0 : index
    %c0_8 = arith.constant 0 : index
    %6 = vector.load %arg2[%c0_7, %c0_8] : memref<128x128xbf16, #tpu.memory_space<vmem>>, vector<128x128xbf16>
    %cst_9 = arith.constant dense<0.000000e+00> : vector<8x128xf32>
    %7 = tpu.matmul %5, %6, %cst_9 {dimension_numbers = #tpu.dot_dimension_numbers<[1], [0], [0], [1], [0, 0, 1, 1], [], []>} : vector<8x128xbf16>, vector<128x128xbf16>, vector<8x128xf32> -> vector<8x128xf32>
    %c0_10 = arith.constant 0 : index
    %c0_11 = arith.constant 0 : index
    %8 = vector.load %arg4[%c0_10, %c0_11] : memref<1x384xf32, #tpu.memory_space<vmem>>, vector<1x128xf32>
    %9 = vector.broadcast %8 : vector<1x128xf32> to vector<8x128xf32>
    %10 = arith.addf %7, %9 : vector<8x128xf32>
    %cst_12 = arith.constant 0.000000e+00 : f32
    %11 = vector.broadcast %cst_12 : f32 to vector<8x128xf32>
    %12 = arith.maximumf %10, %11 : vector<8x128xf32>
    %13 = arith.truncf %12 : vector<8x128xf32> to vector<8x128xbf16>
    %c0_13 = arith.constant 0 : index
    %c0_14 = arith.constant 0 : index
    %14 = vector.load %arg3[%c0_13, %c0_14] : memref<128x256xbf16, #tpu.memory_space<vmem>>, vector<128x128xbf16>
    %cst_15 = arith.constant dense<0.000000e+00> : vector<8x128xf32>
    %15 = tpu.matmul %13, %14, %cst_15 {dimension_numbers = #tpu.dot_dimension_numbers<[1], [0], [0], [1], [0, 0, 1, 1], [], []>} : vector<8x128xbf16>, vector<128x128xbf16>, vector<8x128xf32> -> vector<8x128xf32>
    %c0_16 = arith.constant 0 : index
    %c128 = arith.constant 128 : index
    %16 = vector.load %arg4[%c0_16, %c128] : memref<1x384xf32, #tpu.memory_space<vmem>>, vector<1x128xf32>
    %17 = vector.broadcast %16 : vector<1x128xf32> to vector<8x128xf32>
    %18 = arith.addf %15, %17 : vector<8x128xf32>
    %cst_17 = arith.constant 0.000000e+00 : f32
    %19 = vector.broadcast %cst_17 : f32 to vector<8x128xf32>
    %20 = arith.maximumf %18, %19 : vector<8x128xf32>
    %21 = arith.truncf %20 : vector<8x128xf32> to vector<8x128xbf16>
    %c0_18 = arith.constant 0 : index
    %c128_19 = arith.constant 128 : index
    %22 = vector.load %arg3[%c0_18, %c128_19] : memref<128x256xbf16, #tpu.memory_space<vmem>>, vector<128x128xbf16>
    %cst_20 = arith.constant dense<0.000000e+00> : vector<8x128xf32>
    %23 = tpu.matmul %21, %22, %cst_20 {dimension_numbers = #tpu.dot_dimension_numbers<[1], [0], [0], [1], [0, 0, 1, 1], [], []>} : vector<8x128xbf16>, vector<128x128xbf16>, vector<8x128xf32> -> vector<8x128xf32>
    %c0_21 = arith.constant 0 : index
    %c256 = arith.constant 256 : index
    %24 = vector.load %arg4[%c0_21, %c256] : memref<1x384xf32, #tpu.memory_space<vmem>>, vector<1x128xf32>
    %25 = vector.broadcast %24 : vector<1x128xf32> to vector<8x128xf32>
    %26 = arith.addf %23, %25 : vector<8x128xf32>
    %27 = math.tanh %26 : vector<8x128xf32>
    %c0_22 = arith.constant 0 : index
    %c0_23 = arith.constant 0 : index
    %28 = vector.load %arg5[%c0_22, %c0_23] : memref<8x128xf32, #tpu.memory_space<vmem>>, vector<8x128xf32>
    tpu.vector_store %arg5[%c0_22, %c0_23], %27 {strides = array<i32>} : memref<8x128xf32, #tpu.memory_space<vmem>>, vector<8x128xf32>,
    return
  }
  func.func @transform_0(%arg0: i32) -> (i32, i32) {
    %c0_i32 = arith.constant 0 : i32
    %c0_i32_0 = arith.constant 0 : i32
    return %arg0, %c0_i32 : i32, i32
  }
  func.func @transform_1(%arg0: i32) -> (i32, i32) {
    %c0_i32 = arith.constant 0 : i32
    %c0_i32_0 = arith.constant 0 : i32
    %c0_i32_1 = arith.constant 0 : i32
    return %c0_i32, %c0_i32_0 : i32, i32
  }
  func.func @transform_2(%arg0: i32) -> (i32, i32) {
    %c0_i32 = arith.constant 0 : i32
    %c0_i32_0 = arith.constant 0 : i32
    %c0_i32_1 = arith.constant 0 : i32
    return %c0_i32, %c0_i32_0 : i32, i32
  }
  func.func @transform_3(%arg0: i32) -> (i32, i32) {
    %c0_i32 = arith.constant 0 : i32
    %c0_i32_0 = arith.constant 0 : i32
    %c0_i32_1 = arith.constant 0 : i32
    return %c0_i32, %c0_i32_0 : i32, i32
  }
  func.func @transform_4(%arg0: i32) -> (i32, i32) {
    %c0_i32 = arith.constant 0 : i32
    %c0_i32_0 = arith.constant 0 : i32
    return %arg0, %c0_i32 : i32, i32
  }
}

</mosaic_0001>

<bundles_post_ra>
// kernel: actor_forward.1
= control target key start
LH: loop header
LB: loop body
LE: loop exit
PB: predicated region body
PF: predicated region fallthrough
CT: control target
= control target key end

     0   :  { %9 = vsyncpa [#allocation4], 0  ;;  %s696_s0 = inlined_call_operand.vmem [shape: f32[8,4], index: 0, kind: input, shape index: {}]   ;;  %s697_s1 = inlined_call_operand.hbm [shape: bf16[128,128], index: 1, kind: input, shape index: {}]   ;;  %s698_s2 = inlined_call_operand.hbm [shape: bf16[128,256], index: 2, kind: input, shape index: {}]   ;;  %s699_s3 = inlined_call_operand.vmem [shape: f32[1,384], index: 3, kind: input, shape index: {}]   ;;  %s700_s4 = inlined_call_operand.vmem [shape: f32[8,128], index: 4, kind: output, shape index: {}]  }
   0x1   :  { %10 = vsyncpa [#allocation6], 0  ;;  %s593_s15 = smov [#allocation3]   ;;  %s545_s19 = scalar_lea.hbm %s697_s1, 1024 }
   0x2   :  { %s18_s16 = sshll.u32 %s593_s15, 4  ;;  %p546_p0 = scmp.ne.s32.totalorder %s697_s1, %s545_s19  ;;  %s19_s16 = int_to_ptr.vmem [resolvable:$true] %s18_s16 }
   0x3   :  { %p549_p1 = scmp.lt.u32.totalorder %s545_s19, %s697_s1 }
   0x5   :  { %p551_p2 = pnand %p549_p1, %p546_p0 }
   0x7   :  { %554 = shalt.err (!%p551_p2)
}
   0x8   :  { %s555_s24 = scalar_lea.vmem %s19_s16, 1024  ;;  %p560_p4 = scmp.lt.s32.totalorder %s19_s16, %s19_s16 }
   0x9   :  { %p556_p3 = scmp.ne.s32.totalorder %s19_s16, %s555_s24  ;;  %p561_p5 = scmp.lt.s32.totalorder %s555_s24, %s555_s24 }
   0xb   :  { %p562_p6 = por %p561_p5, %p560_p4 }
   0xd   :  { %p563_p7 = pnand %p562_p6, %p556_p3 }
   0xf   :  { %566 = shalt.err (!%p563_p7)
}
  0x10   :  { %s594_s25 = smov 64   ;;  %s595_s26 = smov 4  }
  0x11   :  { %24 = dma.hbm_to_vmem [thread:$0]  %s697_s1, 1024, %s19_s16, [#allocation4], %s594_s25, %s594_s25, %s595_s26  }
  0x12   :  { %s596_s29 = smov [#allocation5]   ;;  %s567_s7 = scalar_lea.hbm %s698_s2, 2048 }
  0x13   :  { %s30_s30 = sshll.u32 %s596_s29, 4  ;;  %p568_p8 = scmp.ne.s32.totalorder %s698_s2, %s567_s7  ;;  %s31_s30 = int_to_ptr.vmem [resolvable:$true] %s30_s30 }
  0x14   :  { %p571_p9 = scmp.lt.u32.totalorder %s567_s7, %s698_s2 }
  0x16   :  { %p573_p10 = pnand %p571_p9, %p568_p8 }
  0x18   :  { %576 = shalt.err (!%p573_p10)
}
  0x19   :  { %s577_s12 = scalar_lea.vmem %s31_s30, 2048  ;;  %p582_p12 = scmp.lt.s32.totalorder %s31_s30, %s31_s30 }
  0x1a   :  { %p578_p11 = scmp.ne.s32.totalorder %s31_s30, %s577_s12  ;;  %p583_p13 = scmp.lt.s32.totalorder %s577_s12, %s577_s12 }
  0x1c   :  { %p584_p0 = por %p583_p13, %p582_p12 }
  0x1e   :  { %p585_p1 = pnand %p584_p0, %p578_p11 }
  0x20   :  { %588 = shalt.err (!%p585_p1)
}
  0x21   :  { %s597_s1 = smov 128   ;;  %s598_s13 = smov 8  }
  0x22   :  { %36 = dma.hbm_to_vmem [thread:$0]  %s698_s2, 2048, %s31_s30, [#allocation6], %s597_s1, %s597_s1, %s598_s13  }
  0x23   :  { %589 = dma.done.wait [#allocation4], 1024  }
  0x24   :  { %590 = vsyncadd [#allocation4], 4294966272 }
  0x25   :  { %591 = dma.done.wait [#allocation6], 2048  }
  0x26   :  { %592 = vsyncadd [#allocation6], 4294965248  ;;  %v599_v0 = vmov 0.0   ;;  %vm600_vm0 = vmmov 0   ;;  %v519_v1 = vld [vmem:[#allocation3] sm:$0xff]   ;;  %v520_v2 = vld [vmem:[#allocation3 + $0x8] sm:$0xff]  }
  0x27   :  { %451 = vmatprep.subr.bf16.mxu0 %v599_v0  ;;  %46 = vst [vmem:[#allocation2] sm:$0xff] %v599_v0  ;;  %467 = vmatprep.mubr.msk.bf16.mxu0 %vm600_vm0, %v599_v0  ;;  %v521_v3 = vld [vmem:[#allocation3 + $0x10] sm:$0xff]   ;;  %vm48_vm1 = vcmask 31744   ;;  %v47_v4 = vld [vmem:[%s696_s0] sm:$0xff]  ;;  %v527_v5 = vld [vmem:[#allocation5] ss:$8 sps:$4 sm:$0xff]  }
  0x28   :  { %471 = vmatprep.subr.bf16.mxu1 %v599_v0  ;;  %487 = vmatprep.mubr.msk.bf16.mxu1 %vm600_vm0, %v599_v0  ;;  %49 = vst.msk [vmem:[#allocation2] sm:$0xff] %vm48_vm1, %v47_v4  ;;  %v522_v6 = vld [vmem:[#allocation3 + $0x18] sm:$0xff]   ;;  %v523_v8 = vld [vmem:[#allocation3 + $0x20] sm:$0xff]   ;;  %v524_v10 = vld [vmem:[#allocation3 + $0x28] sm:$0xff]  }
  0x29   :  { %452 = vmatpush3.bf16.msra.mxu0 %v519_v1  ;;  %472 = vmatpush3.bf16.msra.mxu1 %v527_v5  ;;  %v528_v7 = vld [vmem:[#allocation5 + $0x10] ss:$8 sps:$4 sm:$0xff]   ;;  %v529_v9 = vld [vmem:[#allocation5 + $0x20] ss:$8 sps:$4 sm:$0xff]   ;;  %v535_v20 = vld [vmem:[#allocation5 + $0x4] ss:$8 sps:$4 sm:$0xff]  }
  0x2a   :  { %453 = vmatprep.subr.bf16.mxu0 %v599_v0  ;;  %473 = vmatprep.subr.bf16.mxu1 %v599_v0  ;;  %v530_v11 = vld [vmem:[#allocation5 + $0x30] ss:$8 sps:$4 sm:$0xff]   ;;  %v531_v13 = vld [vmem:[#allocation5 + $0x40] ss:$8 sps:$4 sm:$0xff]   ;;  %v536_v21 = vld [vmem:[#allocation5 + $0x14] ss:$8 sps:$4 sm:$0xff]  }
  0x2b   :  { %v525_v12 = vld [vmem:[#allocation3 + $0x30] sm:$0xff]   ;;  %v526_v14 = vld [vmem:[#allocation3 + $0x38] sm:$0xff]   ;;  %v533_v18 = vld [vmem:[#allocation5 + $0x60] ss:$8 sps:$4 sm:$0xff]  }
  0x2c   :  { %v532_v16 = vld [vmem:[#allocation5 + $0x50] ss:$8 sps:$4 sm:$0xff]   ;;  %v537_v22 = vld [vmem:[#allocation5 + $0x24] ss:$8 sps:$4 sm:$0xff]   ;;  %v538_v23 = vld [vmem:[#allocation5 + $0x34] ss:$8 sps:$4 sm:$0xff]  }
  0x2d   :  { %454 = vmatpush3.bf16.msra.mxu0 %v520_v2  ;;  %474 = vmatpush3.bf16.msra.mxu1 %v528_v7  ;;  %v534_v19 = vld [vmem:[#allocation5 + $0x70] ss:$8 sps:$4 sm:$0xff]   ;;  %v539_v24 = vld [vmem:[#allocation5 + $0x44] ss:$8 sps:$4 sm:$0xff]   ;;  %v540_v25 = vld [vmem:[#allocation5 + $0x54] ss:$8 sps:$4 sm:$0xff]  }
  0x2e   :  { %455 = vmatprep.subr.bf16.mxu0 %v599_v0  ;;  %475 = vmatprep.subr.bf16.mxu1 %v599_v0  ;;  %v397_v26 = vld [vmem:[%s699_s3] ss:$0 sm:$0xff]  ;;  %v541_v34 = vld [vmem:[#allocation5 + $0x64] ss:$8 sps:$4 sm:$0xff]   ;;  %v542_v35 = vld [vmem:[#allocation5 + $0x74] ss:$8 sps:$4 sm:$0xff]  }
  0x2f   :  { %v50_v15 = vld [vmem:[#allocation2] sm:$0xff] }
  0x30   :  { %v51_v17 = vpack.c.bf16 %v50_v15, %v50_v15  ;;  %v406_v36 = vld [vmem:[%s699_s3 + $0x1] ss:$0 sm:$0xff]  ;;  %v415_v44 = vld [vmem:[%s699_s3 + $0x2] ss:$0 sm:$0xff] }
  0x31   :  { %456 = vmatpush3.bf16.msra.mxu0 %v521_v3  ;;  %476 = vmatpush3.bf16.msra.mxu1 %v529_v9 }
  0x32   :  { %457 = vmatprep.subr.bf16.mxu0 %v599_v0  ;;  %477 = vmatprep.subr.bf16.mxu1 %v599_v0 }
  0x35   :  { %458 = vmatpush3.bf16.msra.mxu0 %v522_v6  ;;  %478 = vmatpush3.bf16.msra.mxu1 %v530_v11 }
  0x36   :  { %459 = vmatprep.subr.bf16.mxu0 %v599_v0  ;;  %479 = vmatprep.subr.bf16.mxu1 %v599_v0 }
  0x39   :  { %460 = vmatpush3.bf16.msra.mxu0 %v523_v8  ;;  %480 = vmatpush3.bf16.msra.mxu1 %v531_v13 }
  0x3a   :  { %461 = vmatprep.subr.bf16.mxu0 %v599_v0  ;;  %481 = vmatprep.subr.bf16.mxu1 %v599_v0 }
  0x3d   :  { %462 = vmatpush3.bf16.msra.mxu0 %v524_v10  ;;  %482 = vmatpush3.bf16.msra.mxu1 %v532_v16 }
  0x3e   :  { %463 = vmatprep.subr.bf16.mxu0 %v599_v0  ;;  %483 = vmatprep.subr.bf16.mxu1 %v599_v0 }
  0x41   :  { %464 = vmatpush3.bf16.msra.mxu0 %v525_v12  ;;  %484 = vmatpush3.bf16.msra.mxu1 %v533_v18 }
  0x42   :  { %465 = vmatprep.subr.bf16.mxu0 %v599_v0  ;;  %485 = vmatprep.subr.bf16.mxu1 %v599_v0 }
  0x45   :  { %466 = vmatpush3.bf16.msra.mxu0 %v526_v14  ;;  %486 = vmatpush3.bf16.msra.mxu1 %v534_v19 }
  0x46   :  { %491 = vmatprep.subr.bf16.mxu0 %v599_v0 }
  0x48   :  { %468 = vmatmul.mubr.bf16.vlgmr.msra.gmra.mrb[0].mxu0 %v51_v17 }
  0x49   :  { %507 = vmatprep.mubr.msk.bf16.mxu0 %vm600_vm0, %v599_v0  ;;  %492 = vmatpush3.bf16.msra.mxu0 %v535_v20 }
  0x4a   :  { %493 = vmatprep.subr.bf16.mxu0 %v599_v0 }
  0x4d   :  { %494 = vmatpush3.bf16.msra.mxu0 %v536_v21 }
  0x4e   :  { %495 = vmatprep.subr.bf16.mxu0 %v599_v0 }
  0x51   :  { %496 = vmatpush3.bf16.msra.mxu0 %v537_v22 }
  0x52   :  { %497 = vmatprep.subr.bf16.mxu0 %v599_v0 }
  0x55   :  { %498 = vmatpush3.bf16.msra.mxu0 %v538_v23 }
  0x56   :  { %499 = vmatprep.subr.bf16.mxu0 %v599_v0 }
  0x59   :  { %500 = vmatpush3.bf16.msra.mxu0 %v539_v24 }
  0x5a   :  { %501 = vmatprep.subr.bf16.mxu0 %v599_v0 }
  0x5d   :  { %502 = vmatpush3.bf16.msra.mxu0 %v540_v25 }
  0x5e   :  { %503 = vmatprep.subr.bf16.mxu0 %v599_v0 }
  0x61   :  { %504 = vmatpush3.bf16.msra.mxu0 %v541_v34 }
  0x62   :  { %505 = vmatprep.subr.bf16.mxu0 %v599_v0 }
  0x65   :  { %506 = vmatpush3.bf16.msra.mxu0 %v542_v35 }
 0x11b   :  { %v157_v27 = vpop.f32.mrb[0].mxu0 }
 0x11c   :  { %v158_v28 = vadd.f32 %v397_v26, %v157_v27  ;;  %v469_v29 = vpop.f32.mrb[1].mxu0 }
 0x11d   :  { %v160_v30 = vpop.f32.mrb[2].mxu0 }
 0x11e   :  { %v163_v31 = vmax.f32 %v158_v28, 0.0  ;;  %v470_v32 = vpop.f32.mrb[3].mxu0 }
 0x120   :  { %v164_v33 = vpack.c.bf16 %v163_v31, %v163_v31 }
 0x122   :  { %488 = vmatmul.mubr.bf16.vlgmr.msra.gmra.mrb[0].mxu1 %v164_v33 }
 0x1f5   :  { %v270_v37 = vpop.f32.mrb[0].mxu1 }
 0x1f6   :  { %v271_v38 = vadd.f32 %v406_v36, %v270_v37  ;;  %v489_v39 = vpop.f32.mrb[1].mxu1 }
 0x1f7   :  { %v273_v40 = vpop.f32.mrb[2].mxu1 }
 0x1f8   :  { %v276_v41 = vmax.f32 %v271_v38, 0.0  ;;  %v490_v42 = vpop.f32.mrb[3].mxu1 }
 0x1fa   :  { %v277_v43 = vpack.c.bf16 %v276_v41, %v276_v41 }
 0x1fc   :  { %508 = vmatmul.mubr.bf16.vlgmr.msra.gmra.mrb[4].mxu0 %v277_v43 }
 0x2cf   :  { %v383_v45 = vpop.f32.mrb[4].mxu0 }
 0x2d0   :  { %v384_v46 = vadd.f32 %v415_v44, %v383_v45  ;;  %v509_v47 = vpop.f32.mrb[5].mxu0 }
 0x2d1   :  { %v386_v48 = vpop.f32.mrb[6].mxu0 }
 0x2d2   :  { %543 = vtanh.f32 %v384_v46  ;;  %v510_v49 = vpop.f32.mrb[7].mxu0 }
 0x2dc   :  { %v544_v50 = vpop.eup %543 }
 0x2dd   :  { %390 = vst [vmem:[%s700_s4] sm:$0xff] %v544_v50 }
 0x2de   :  { %395 = vsyncpa [#allocation4], 1 }
 0x2df   :  { %396 = vsyncpa [#allocation6], 1 }

</bundles_post_ra>
